<compile_context>
chip_gen: v7x
topology: tpu7x:2x2x1
jax: 0.10.0
libtpu: 0.0.40
codegen_flags: <defaults>
</compile_context>

<pallas_src>
import jax
import jax.numpy as jnp
from jax.experimental import pallas as pl
from jax.experimental.pallas import tpu as pltpu


_BLOCK_BYTES = 4 * 1024 * 1024  # ~4 MiB per tile; in+out double-buffered = 16 MiB.


def _drop_path_kernel(scale_ref, x_ref, o_ref):
    # (bt, 1) f32 per-sample scale broadcast over the (bt, T) tile.
    o_ref[...] = (x_ref[...].astype(jnp.float32) * scale_ref[...]).astype(o_ref.dtype)


def _largest_divisor(dim, quantum, cap):
    """Largest d with d | dim, d % quantum == 0, d <= cap. None if impossible."""
    if dim % quantum != 0 or cap < quantum:
        return None
    m = dim // quantum
    d = min(m, cap // quantum)
    while d >= 1:
        if m % d == 0:
            return quantum * d
        d -= 1
    return None


def drop_path(x, drop_prob: float = 0.0, training: bool = False, *, key=None, seed: int = 0):
    """Pallas DropPath matching torch `drop_path` forward semantics."""
    if drop_prob == 0.0 or not training:
        return x  # identity, same as PyTorch

    keep_prob = 1.0 - drop_prob
    if key is None:
        key = jax.random.PRNGKey(seed)

    B = x.shape[0]
    F = 1
    for s in x.shape[1:]:
        F *= s

    # Per-sample Bernoulli(keep_prob) / keep_prob, kept in f32 (no bf16
    # quantization of 1/keep_prob).
    keep = jax.random.bernoulli(key, p=keep_prob, shape=(B, 1))
    scale = keep.astype(jnp.float32) / keep_prob

    itemsize = jnp.dtype(x.dtype).itemsize
    quantum = max(8, 32 // itemsize)                     # 8 f32 / 16 bf16 / 32 int8
    budget_elems = max(128 * quantum, _BLOCK_BYTES // itemsize)

    x2 = x.reshape(B, F)
    # Lane-dense output: pad F to a multiple of 128 (avoids masked vst.msk stores).
    F_pad = ((F + 127) // 128) * 128
    if F_pad != F:
        x2 = jnp.pad(x2, ((0, 0), (0, F_pad - F)))

    # Lane axis T: cap so even a minimal `quantum`-row block stays under budget.
    T = _largest_divisor(F_pad, 128, max(128, budget_elems // quantum))
    rows_cap = max(1, budget_elems // T)
    if B <= rows_cap:
        bt = B                                            # full batch axis (always legal)
    else:
        bt = _largest_divisor(B, quantum, rows_cap) or _largest_divisor(B, 8, rows_cap)

    if bt is None:
        # Ragged batch that can't be tiled cleanly within the byte budget (rare).
        # TODO(synk): support ragged sublane blocks instead of this dense fallback.
        bcast = scale.reshape((B,) + (1,) * (x.ndim - 1))
        return (x.astype(jnp.float32) * bcast).astype(x.dtype)

    assert bt * T <= budget_elems, (bt, T, budget_elems)  # never overshoot VMEM budget

    # Feature-tile axis first -> non-degenerate parallel axis for v7x megacore
    # even when bt == B.
    grid = (F_pad // T, B // bt)

    out = pl.pallas_call(
        _drop_path_kernel,
        out_shape=jax.ShapeDtypeStruct((B, F_pad), x.dtype),
        grid=grid,
        in_specs=[
            pl.BlockSpec((bt, 1), lambda t, b: (b, 0)),   # per-sample f32 scale
            pl.BlockSpec((bt, T), lambda t, b: (b, t)),   # activation tile
        ],
        out_specs=pl.BlockSpec((bt, T), lambda t, b: (b, t)),
        compiler_params=pltpu.CompilerParams(
            dimension_semantics=("parallel", "parallel"),
            vmem_limit_bytes=32 * 1024 * 1024,            # v5e default is only 16 MiB
        ),
        cost_estimate=pl.CostEstimate(
            flops=B * F_pad,
            transcendentals=0,
            bytes_accessed=2 * B * F_pad * itemsize + B * 4,
        ),
    )(scale, x2)

    if F_pad != F:
        out = out[:, :F]
    return out.reshape(x.shape)


class DropPath:
    """Mirror of the PyTorch nn.Module (no parameters; drop_prob only)."""

    def __init__(self, drop_prob: float = 0.0):
        self.drop_prob = drop_prob
        self.training = True

    def __call__(self, x, key=None, seed: int = 0):
        return drop_path(x, self.drop_prob, self.training, key=key, seed=seed)


def _check_contract(y, x_in, keep_prob, tol):
    """Every sample must be all-zeros (dropped) or exactly x/keep_prob (kept)."""
    ok = True
    for b in range(x_in.shape[0]):
        yb = jnp.asarray(y[b], jnp.float32)
        xb = jnp.asarray(x_in[b], jnp.float32)
        dropped = bool(jnp.allclose(yb, 0.0, atol=tol))
        kept = bool(jnp.allclose(yb, xb / keep_prob, rtol=tol, atol=tol))
        ok = ok and (dropped or kept)
    return ok


if __name__ == "__main__":
    ok = True
    mod = DropPath(drop_prob=0.3)
    keep_prob = 1.0 - mod.drop_prob

    # f32, 128-multiple flattened feature dim -> main kernel path.
    B, N, D = 2, 8, 32
    x = jax.random.normal(jax.random.PRNGKey(0), (B, N, D), dtype=jnp.float32)
    y = jax.block_until_ready(mod(x, seed=1234))
    ok = ok and y.shape == x.shape and _check_contract(y, x, keep_prob, 1e-5)

    # bf16 -> exercises dtype-aware sublane quantum (16) and f32 scale math.
    xb = jax.random.normal(jax.random.PRNGKey(1), (4, 3, 128), dtype=jnp.bfloat16)
    yb = jax.block_until_ready(mod(xb, seed=7))
    ok = ok and yb.shape == xb.shape and _check_contract(yb, xb, keep_prob, 2e-2)

    # Non-128-multiple feature dim -> exercises the pad + slice path.
    xr = jax.random.normal(jax.random.PRNGKey(2), (2, 5, 7), dtype=jnp.float32)
    yr = jax.block_until_ready(mod(xr, seed=3))
    ok = ok and yr.shape == xr.shape and _check_contract(yr, xr, keep_prob, 1e-5)

    # Eval mode (and drop_prob == 0) must be the identity, like PyTorch.
    mod.training = False
    y_eval = jax.block_until_ready(mod(x))
    ok = ok and bool(jnp.allclose(y_eval, x))

    if ok:
        print("KERNEL_OK")
</pallas_src>

<mosaic_0001>
module attributes {stable_mosaic.version = 11 : i64} {
  func.func @_drop_path_kernel(%arg0: i32, %arg1: i32, %arg2: memref<2x1xf32, #tpu.memory_space<vmem>>, %arg3: memref<2x256xf32, #tpu.memory_space<vmem>>, %arg4: memref<2x256xf32, #tpu.memory_space<vmem>>) attributes {dimension_semantics = [#tpu.dimension_semantics<parallel>, #tpu.dimension_semantics<parallel>], iteration_bounds = array<i64: 1, 1>, scalar_prefetch = 0 : i64, scratch_operands = 0 : i64, tpu.core_type = #tpu.core_type<tc>, window_params = [{transform_indices = @transform_0, window_bounds = array<i64: 2, 1>}, {transform_indices = @transform_1, window_bounds = array<i64: 2, 256>}, {transform_indices = @transform_2, window_bounds = array<i64: 2, 256>}]} {
    %c0 = arith.constant 0 : index
    %c0_0 = arith.constant 0 : index
    %0 = vector.load %arg3[%c0, %c0_0] : memref<2x256xf32, #tpu.memory_space<vmem>>, vector<2x256xf32>
    %c0_1 = arith.constant 0 : index
    %c0_2 = arith.constant 0 : index
    %1 = vector.load %arg2[%c0_1, %c0_2] : memref<2x1xf32, #tpu.memory_space<vmem>>, vector<2x1xf32>
    %2 = vector.broadcast %1 : vector<2x1xf32> to vector<2x256xf32>
    %3 = arith.mulf %0, %2 : vector<2x256xf32>
    %c0_3 = arith.constant 0 : index
    %c0_4 = arith.constant 0 : index
    %4 = vector.load %arg4[%c0_3, %c0_4] : memref<2x256xf32, #tpu.memory_space<vmem>>, vector<2x256xf32>
    tpu.vector_store %arg4[%c0_3, %c0_4], %3 {strides = array<i32>} : memref<2x256xf32, #tpu.memory_space<vmem>>, vector<2x256xf32>,
    return
  }
  func.func @transform_0(%arg0: i32, %arg1: i32) -> (i32, i32) {
    %c0_i32 = arith.constant 0 : i32
    %c0_i32_0 = arith.constant 0 : i32
    return %arg1, %c0_i32 : i32, i32
  }
  func.func @transform_1(%arg0: i32, %arg1: i32) -> (i32, i32) {
    %c0_i32 = arith.constant 0 : i32
    return %arg1, %arg0 : i32, i32
  }
  func.func @transform_2(%arg0: i32, %arg1: i32) -> (i32, i32) {
    %c0_i32 = arith.constant 0 : i32
    return %arg1, %arg0 : i32, i32
  }
}

</mosaic_0001>

<bundles_post_ra>
// kernel: tpu_custom_call.1
= control target key start
LH: loop header
LB: loop body
LE: loop exit
PB: predicated region body
PF: predicated region fallthrough
CT: control target
= control target key end

     0   :  { %v70_v1 = vmov 0   ;;  %s106_s0 = inlined_call_operand.vmem [shape: f32[2,1], index: 0, kind: input, shape index: {}]   ;;  %s107_s1 = inlined_call_operand.vmem [shape: f32[2,256], index: 1, kind: input, shape index: {}]   ;;  %s108_s2 = inlined_call_operand.hbm [shape: f32[2,256], index: 2, kind: output, shape index: {}]  }
   0x1   :  { %v13_v0 = vld [vmem:[%s106_s0] sm:$0x3]  ;;  %45 = vset.pattern.permute.xlu0 %v70_v1 }
   0x2   :  { %7 = vsyncpa [#allocation3], 0  ;;  %16 = vperm.xlu0 %45, %v13_v0   ;;  %v71_v2 = vmov 269488144   ;;  %v21_v4 = vlaneseq  ;;  %v12_v9 = vld [vmem:[%s107_s1] sm:$0xf] }
   0x3   :  { %v19_v3 = vunpack.c.l.s4 %v71_v2  ;;  %s72_s13 = smov [#allocation2]  }
   0x4   :  { %v22_v6 = vshrl.u32 %v21_v4, 7  ;;  %s34_s14 = sshll.u32 %s72_s13, 4  ;;  %s35_s14 = int_to_ptr.vmem [resolvable:$true] %s34_s14 }
   0x5   :  { %v20_v5 = vunpack.c.0.s8 %v19_v3  ;;  %s46_s0 = scalar_lea.vmem %s35_s14, 64  ;;  %p51_p1 = scmp.lt.s32.totalorder %s35_s14, %s35_s14 }
   0x6   :  { %p47_p0 = scmp.ne.s32.totalorder %s35_s14, %s46_s0  ;;  %p52_p2 = scmp.lt.s32.totalorder %s46_s0, %s46_s0 }
   0x7   :  { %v23_v7 = vsub.s32 %v20_v5, %v22_v6 }
   0x8   :  { %p53_p3 = por %p52_p2, %p51_p1 }
   0xa   :  { %p54_p4 = pnand %p53_p3, %p47_p0 }
  0x81   :  { %v17_v8 = vpop.permute.xlu0 %16 }
  0x82   :  { %v24_v10 = vrot.slane %v17_v8, %v23_v7 }
  0x84   :  { %v26_v11 = vmul.f32 %v24_v10, %v12_v9 }
  0x86   :  { %27 = vst [vmem:[#allocation2] sm:$0xf] %v26_v11 }
  0x87   :  { %57 = shalt.err (!%p54_p4)
}
  0x88   :  { %s58_s17 = scalar_lea.hbm %s108_s2, 64 }
  0x89   :  { %p59_p5 = scmp.ne.s32.totalorder %s108_s2, %s58_s17  ;;  %p62_p6 = scmp.lt.u32.totalorder %s58_s17, %s108_s2 }
  0x8b   :  { %p64_p7 = pnand %p62_p6, %p59_p5 }
  0x8d   :  { %67 = shalt.err (!%p64_p7)
}
  0x8e   :  { %37 = dma.vmem_to_hbm [thread:$0]  %s35_s14, 64, %s108_s2, [#allocation3]  }
  0x8f   :  { %68 = dma.done.wait [#allocation3], 64  }
  0x90   :  { %69 = vsyncadd [#allocation3], 4294967232 }
  0x91   :  { %41 = vsyncpa [#allocation3], 1 }

</bundles_post_ra>
